<compile_context>
chip_gen: v7x
topology: tpu7x:2x2x1
jax: 0.10.0
libtpu: 0.0.40
codegen_flags: <defaults>
</compile_context>

<pallas_src>
import jax
import jax.numpy as jnp
from jax.experimental import pallas as pl
from jax.experimental.pallas import tpu as pltpu


def simplenet_kernel(w0_ref, b0_ref, w1_ref, b1_ref, w2_ref, b2_ref,
                     x_ref, o_ref):
    # x_ref: (2, TB) f32, batch on lanes.  Weight refs are flat SMEM arrays in
    # PyTorch layout: w[out, in] flattened row-major, b[out].
    x0 = x_ref[0:1, :]
    x1 = x_ref[1:2, :]

    # Layer 0: Linear(2, 4) + tanh  — 4 output rows, unrolled broadcast-FMAs.
    h0 = []
    for j in range(4):
        acc = x0 * w0_ref[2 * j + 0] + x1 * w0_ref[2 * j + 1] + b0_ref[j]
        h0.append(jnp.tanh(acc))

    # Layer 1: Linear(4, 3) + tanh
    h1 = []
    for j in range(3):
        acc = (h0[0] * w1_ref[4 * j + 0]
               + h0[1] * w1_ref[4 * j + 1]
               + h0[2] * w1_ref[4 * j + 2]
               + h0[3] * w1_ref[4 * j + 3]
               + b1_ref[j])
        h1.append(jnp.tanh(acc))

    # Layer 2: Linear(3, 1), no activation on the returned value.
    out = (h1[0] * w2_ref[0] + h1[1] * w2_ref[1] + h1[2] * w2_ref[2]
           + b2_ref[0])
    o_ref[...] = out.astype(o_ref.dtype)


def simplenet_forward(x, params):
    """x: [B, 2] float32.  params: ((w0,b0),(w1,b1),(w2,b2)) in PyTorch layout
    (w: [out, in], b: [out]).  Returns [B, 1] float32."""
    (w0, b0), (w1, b1), (w2, b2) = params
    B = x.shape[0]

    # Batch-on-lanes layout; transpose once in the wrapper.
    x_t = jnp.asarray(x, jnp.float32).T                      # (2, B)

    # Batch tile: lane-dense multiple of 128, capped so the double-buffered
    # (2,TB)+(1,TB) f32 tiles stay far below even v5e's 16 MiB scoped VMEM.
    TB = min(65536, pl.cdiv(B, 128) * 128)
    B_pad = pl.cdiv(B, TB) * TB
    if B_pad != B:
        x_t = jnp.pad(x_t, ((0, 0), (0, B_pad - B)))

    smem = pl.BlockSpec(memory_space=pltpu.MemorySpace.SMEM)
    out = pl.pallas_call(
        simplenet_kernel,
        out_shape=jax.ShapeDtypeStruct((1, B_pad), jnp.float32),
        grid=(B_pad // TB,),
        in_specs=[smem, smem, smem, smem, smem, smem,
                  pl.BlockSpec((2, TB), lambda i: (0, i))],
        out_specs=pl.BlockSpec((1, TB), lambda i: (0, i)),
        compiler_params=pltpu.CompilerParams(
            dimension_semantics=("parallel",)),
    )(w0.reshape(-1), b0.reshape(-1),
      w1.reshape(-1), b1.reshape(-1),
      w2.reshape(-1), b2.reshape(-1),
      x_t)

    return out[:, :B].T                                      # (B, 1)


def init_params(key):
    # Deterministic init mimicking nn.Linear's uniform(-1/sqrt(fan_in), ...).
    # Stored in PyTorch convention: w [out, in], b [out].
    dims = [(2, 4), (4, 3), (3, 1)]
    params = []
    for fan_in, fan_out in dims:
        key, kw, kb = jax.random.split(key, 3)
        bound = 1.0 / jnp.sqrt(float(fan_in))
        w = jax.random.uniform(kw, (fan_out, fan_in), jnp.float32, -bound, bound)
        b = jax.random.uniform(kb, (fan_out,), jnp.float32, -bound, bound)
        params.append((w, b))
    return params


def simplenet_ref(x, params):
    # Pure-JAX reference for correctness checking.
    (w0, b0), (w1, b1), (w2, b2) = params
    h = jnp.tanh(x @ w0.T + b0)
    h = jnp.tanh(h @ w1.T + b1)
    return h @ w2.T + b2


if __name__ == "__main__":
    key = jax.random.PRNGKey(0)
    key, kx = jax.random.split(key)

    B = 8  # small batch
    x = jax.random.normal(kx, (B, 2), jnp.float32)
    params = init_params(key)

    out = simplenet_forward(x, params)
    out = jax.block_until_ready(out)

    ref = simplenet_ref(x, params)
    assert out.shape == (B, 1), out.shape
    assert jnp.allclose(out, ref, atol=1e-5, rtol=1e-5), (out, ref)

    print("KERNEL_OK")
</pallas_src>

<mosaic_0001>
module attributes {stable_mosaic.version = 11 : i64} {
  func.func @simplenet_kernel(%arg0: i32, %arg1: memref<8xf32, #tpu.memory_space<smem>>, %arg2: memref<4xf32, #tpu.memory_space<smem>>, %arg3: memref<12xf32, #tpu.memory_space<smem>>, %arg4: memref<3xf32, #tpu.memory_space<smem>>, %arg5: memref<3xf32, #tpu.memory_space<smem>>, %arg6: memref<1xf32, #tpu.memory_space<smem>>, %arg7: memref<2x128xf32, #tpu.memory_space<vmem>>, %arg8: memref<1x128xf32, #tpu.memory_space<vmem>>) attributes {dimension_semantics = [#tpu.dimension_semantics<parallel>], iteration_bounds = array<i64: 1>, scalar_prefetch = 0 : i64, scratch_operands = 0 : i64, tpu.core_type = #tpu.core_type<tc>, window_params = [{transform_indices = @transform_0, window_bounds = array<i64: 8>}, {transform_indices = @transform_1, window_bounds = array<i64: 4>}, {transform_indices = @transform_2, window_bounds = array<i64: 12>}, {transform_indices = @transform_3, window_bounds = array<i64: 3>}, {transform_indices = @transform_4, window_bounds = array<i64: 3>}, {transform_indices = @transform_5, window_bounds = array<i64: 1>}, {transform_indices = @transform_6, window_bounds = array<i64: 2, 128>}, {transform_indices = @transform_7, window_bounds = array<i64: 1, 128>}]} {
    %c0 = arith.constant 0 : index
    %c0_0 = arith.constant 0 : index
    %0 = vector.load %arg7[%c0, %c0_0] : memref<2x128xf32, #tpu.memory_space<vmem>>, vector<1x128xf32>
    %c1 = arith.constant 1 : index
    %c0_1 = arith.constant 0 : index
    %1 = vector.load %arg7[%c1, %c0_1] : memref<2x128xf32, #tpu.memory_space<vmem>>, vector<1x128xf32>
    %c0_2 = arith.constant 0 : index
    %2 = memref.load %arg1[%c0_2] : memref<8xf32, #tpu.memory_space<smem>>
    %3 = vector.broadcast %2 : f32 to vector<1x128xf32>
    %4 = arith.mulf %0, %3 : vector<1x128xf32>
    %c1_3 = arith.constant 1 : index
    %5 = memref.load %arg1[%c1_3] : memref<8xf32, #tpu.memory_space<smem>>
    %6 = vector.broadcast %5 : f32 to vector<1x128xf32>
    %7 = arith.mulf %1, %6 : vector<1x128xf32>
    %8 = arith.addf %4, %7 : vector<1x128xf32>
    %c0_4 = arith.constant 0 : index
    %9 = memref.load %arg2[%c0_4] : memref<4xf32, #tpu.memory_space<smem>>
    %10 = vector.broadcast %9 : f32 to vector<1x128xf32>
    %11 = arith.addf %8, %10 : vector<1x128xf32>
    %12 = math.tanh %11 : vector<1x128xf32>
    %c2 = arith.constant 2 : index
    %13 = memref.load %arg1[%c2] : memref<8xf32, #tpu.memory_space<smem>>
    %14 = vector.broadcast %13 : f32 to vector<1x128xf32>
    %15 = arith.mulf %0, %14 : vector<1x128xf32>
    %c3 = arith.constant 3 : index
    %16 = memref.load %arg1[%c3] : memref<8xf32, #tpu.memory_space<smem>>
    %17 = vector.broadcast %16 : f32 to vector<1x128xf32>
    %18 = arith.mulf %1, %17 : vector<1x128xf32>
    %19 = arith.addf %15, %18 : vector<1x128xf32>
    %c1_5 = arith.constant 1 : index
    %20 = memref.load %arg2[%c1_5] : memref<4xf32, #tpu.memory_space<smem>>
    %21 = vector.broadcast %20 : f32 to vector<1x128xf32>
    %22 = arith.addf %19, %21 : vector<1x128xf32>
    %23 = math.tanh %22 : vector<1x128xf32>
    %c4 = arith.constant 4 : index
    %24 = memref.load %arg1[%c4] : memref<8xf32, #tpu.memory_space<smem>>
    %25 = vector.broadcast %24 : f32 to vector<1x128xf32>
    %26 = arith.mulf %0, %25 : vector<1x128xf32>
    %c5 = arith.constant 5 : index
    %27 = memref.load %arg1[%c5] : memref<8xf32, #tpu.memory_space<smem>>
    %28 = vector.broadcast %27 : f32 to vector<1x128xf32>
    %29 = arith.mulf %1, %28 : vector<1x128xf32>
    %30 = arith.addf %26, %29 : vector<1x128xf32>
    %c2_6 = arith.constant 2 : index
    %31 = memref.load %arg2[%c2_6] : memref<4xf32, #tpu.memory_space<smem>>
    %32 = vector.broadcast %31 : f32 to vector<1x128xf32>
    %33 = arith.addf %30, %32 : vector<1x128xf32>
    %34 = math.tanh %33 : vector<1x128xf32>
    %c6 = arith.constant 6 : index
    %35 = memref.load %arg1[%c6] : memref<8xf32, #tpu.memory_space<smem>>
    %36 = vector.broadcast %35 : f32 to vector<1x128xf32>
    %37 = arith.mulf %0, %36 : vector<1x128xf32>
    %c7 = arith.constant 7 : index
    %38 = memref.load %arg1[%c7] : memref<8xf32, #tpu.memory_space<smem>>
    %39 = vector.broadcast %38 : f32 to vector<1x128xf32>
    %40 = arith.mulf %1, %39 : vector<1x128xf32>
    %41 = arith.addf %37, %40 : vector<1x128xf32>
    %c3_7 = arith.constant 3 : index
    %42 = memref.load %arg2[%c3_7] : memref<4xf32, #tpu.memory_space<smem>>
    %43 = vector.broadcast %42 : f32 to vector<1x128xf32>
    %44 = arith.addf %41, %43 : vector<1x128xf32>
    %45 = math.tanh %44 : vector<1x128xf32>
    %c0_8 = arith.constant 0 : index
    %46 = memref.load %arg3[%c0_8] : memref<12xf32, #tpu.memory_space<smem>>
    %47 = vector.broadcast %46 : f32 to vector<1x128xf32>
    %48 = arith.mulf %12, %47 : vector<1x128xf32>
    %c1_9 = arith.constant 1 : index
    %49 = memref.load %arg3[%c1_9] : memref<12xf32, #tpu.memory_space<smem>>
    %50 = vector.broadcast %49 : f32 to vector<1x128xf32>
    %51 = arith.mulf %23, %50 : vector<1x128xf32>
    %52 = arith.addf %48, %51 : vector<1x128xf32>
    %c2_10 = arith.constant 2 : index
    %53 = memref.load %arg3[%c2_10] : memref<12xf32, #tpu.memory_space<smem>>
    %54 = vector.broadcast %53 : f32 to vector<1x128xf32>
    %55 = arith.mulf %34, %54 : vector<1x128xf32>
    %56 = arith.addf %52, %55 : vector<1x128xf32>
    %c3_11 = arith.constant 3 : index
    %57 = memref.load %arg3[%c3_11] : memref<12xf32, #tpu.memory_space<smem>>
    %58 = vector.broadcast %57 : f32 to vector<1x128xf32>
    %59 = arith.mulf %45, %58 : vector<1x128xf32>
    %60 = arith.addf %56, %59 : vector<1x128xf32>
    %c0_12 = arith.constant 0 : index
    %61 = memref.load %arg4[%c0_12] : memref<3xf32, #tpu.memory_space<smem>>
    %62 = vector.broadcast %61 : f32 to vector<1x128xf32>
    %63 = arith.addf %60, %62 : vector<1x128xf32>
    %64 = math.tanh %63 : vector<1x128xf32>
    %c4_13 = arith.constant 4 : index
    %65 = memref.load %arg3[%c4_13] : memref<12xf32, #tpu.memory_space<smem>>
    %66 = vector.broadcast %65 : f32 to vector<1x128xf32>
    %67 = arith.mulf %12, %66 : vector<1x128xf32>
    %c5_14 = arith.constant 5 : index
    %68 = memref.load %arg3[%c5_14] : memref<12xf32, #tpu.memory_space<smem>>
    %69 = vector.broadcast %68 : f32 to vector<1x128xf32>
    %70 = arith.mulf %23, %69 : vector<1x128xf32>
    %71 = arith.addf %67, %70 : vector<1x128xf32>
    %c6_15 = arith.constant 6 : index
    %72 = memref.load %arg3[%c6_15] : memref<12xf32, #tpu.memory_space<smem>>
    %73 = vector.broadcast %72 : f32 to vector<1x128xf32>
    %74 = arith.mulf %34, %73 : vector<1x128xf32>
    %75 = arith.addf %71, %74 : vector<1x128xf32>
    %c7_16 = arith.constant 7 : index
    %76 = memref.load %arg3[%c7_16] : memref<12xf32, #tpu.memory_space<smem>>
    %77 = vector.broadcast %76 : f32 to vector<1x128xf32>
    %78 = arith.mulf %45, %77 : vector<1x128xf32>
    %79 = arith.addf %75, %78 : vector<1x128xf32>
    %c1_17 = arith.constant 1 : index
    %80 = memref.load %arg4[%c1_17] : memref<3xf32, #tpu.memory_space<smem>>
    %81 = vector.broadcast %80 : f32 to vector<1x128xf32>
    %82 = arith.addf %79, %81 : vector<1x128xf32>
    %83 = math.tanh %82 : vector<1x128xf32>
    %c8 = arith.constant 8 : index
    %84 = memref.load %arg3[%c8] : memref<12xf32, #tpu.memory_space<smem>>
    %85 = vector.broadcast %84 : f32 to vector<1x128xf32>
    %86 = arith.mulf %12, %85 : vector<1x128xf32>
    %c9 = arith.constant 9 : index
    %87 = memref.load %arg3[%c9] : memref<12xf32, #tpu.memory_space<smem>>
    %88 = vector.broadcast %87 : f32 to vector<1x128xf32>
    %89 = arith.mulf %23, %88 : vector<1x128xf32>
    %90 = arith.addf %86, %89 : vector<1x128xf32>
    %c10 = arith.constant 10 : index
    %91 = memref.load %arg3[%c10] : memref<12xf32, #tpu.memory_space<smem>>
    %92 = vector.broadcast %91 : f32 to vector<1x128xf32>
    %93 = arith.mulf %34, %92 : vector<1x128xf32>
    %94 = arith.addf %90, %93 : vector<1x128xf32>
    %c11 = arith.constant 11 : index
    %95 = memref.load %arg3[%c11] : memref<12xf32, #tpu.memory_space<smem>>
    %96 = vector.broadcast %95 : f32 to vector<1x128xf32>
    %97 = arith.mulf %45, %96 : vector<1x128xf32>
    %98 = arith.addf %94, %97 : vector<1x128xf32>
    %c2_18 = arith.constant 2 : index
    %99 = memref.load %arg4[%c2_18] : memref<3xf32, #tpu.memory_space<smem>>
    %100 = vector.broadcast %99 : f32 to vector<1x128xf32>
    %101 = arith.addf %98, %100 : vector<1x128xf32>
    %102 = math.tanh %101 : vector<1x128xf32>
    %c0_19 = arith.constant 0 : index
    %103 = memref.load %arg5[%c0_19] : memref<3xf32, #tpu.memory_space<smem>>
    %104 = vector.broadcast %103 : f32 to vector<1x128xf32>
    %105 = arith.mulf %64, %104 : vector<1x128xf32>
    %c1_20 = arith.constant 1 : index
    %106 = memref.load %arg5[%c1_20] : memref<3xf32, #tpu.memory_space<smem>>
    %107 = vector.broadcast %106 : f32 to vector<1x128xf32>
    %108 = arith.mulf %83, %107 : vector<1x128xf32>
    %109 = arith.addf %105, %108 : vector<1x128xf32>
    %c2_21 = arith.constant 2 : index
    %110 = memref.load %arg5[%c2_21] : memref<3xf32, #tpu.memory_space<smem>>
    %111 = vector.broadcast %110 : f32 to vector<1x128xf32>
    %112 = arith.mulf %102, %111 : vector<1x128xf32>
    %113 = arith.addf %109, %112 : vector<1x128xf32>
    %c0_22 = arith.constant 0 : index
    %114 = memref.load %arg6[%c0_22] : memref<1xf32, #tpu.memory_space<smem>>
    %115 = vector.broadcast %114 : f32 to vector<1x128xf32>
    %116 = arith.addf %113, %115 : vector<1x128xf32>
    %c0_23 = arith.constant 0 : index
    %c0_24 = arith.constant 0 : index
    %117 = vector.load %arg8[%c0_23, %c0_24] : memref<1x128xf32, #tpu.memory_space<vmem>>, vector<1x128xf32>
    tpu.vector_store %arg8[%c0_23, %c0_24], %116 {strides = array<i32>} : memref<1x128xf32, #tpu.memory_space<vmem>>, vector<1x128xf32>,
    return
  }
  func.func @transform_0(%arg0: i32) -> i32 {
    %c0_i32 = arith.constant 0 : i32
    %c0_i32_0 = arith.constant 0 : i32
    return %c0_i32 : i32
  }
  func.func @transform_1(%arg0: i32) -> i32 {
    %c0_i32 = arith.constant 0 : i32
    %c0_i32_0 = arith.constant 0 : i32
    return %c0_i32 : i32
  }
  func.func @transform_2(%arg0: i32) -> i32 {
    %c0_i32 = arith.constant 0 : i32
    %c0_i32_0 = arith.constant 0 : i32
    return %c0_i32 : i32
  }
  func.func @transform_3(%arg0: i32) -> i32 {
    %c0_i32 = arith.constant 0 : i32
    %c0_i32_0 = arith.constant 0 : i32
    return %c0_i32 : i32
  }
  func.func @transform_4(%arg0: i32) -> i32 {
    %c0_i32 = arith.constant 0 : i32
    %c0_i32_0 = arith.constant 0 : i32
    return %c0_i32 : i32
  }
  func.func @transform_5(%arg0: i32) -> i32 {
    %c0_i32 = arith.constant 0 : i32
    %c0_i32_0 = arith.constant 0 : i32
    return %c0_i32 : i32
  }
  func.func @transform_6(%arg0: i32) -> (i32, i32) {
    %c0_i32 = arith.constant 0 : i32
    %c0_i32_0 = arith.constant 0 : i32
    return %c0_i32, %arg0 : i32, i32
  }
  func.func @transform_7(%arg0: i32) -> (i32, i32) {
    %c0_i32 = arith.constant 0 : i32
    %c0_i32_0 = arith.constant 0 : i32
    return %c0_i32, %arg0 : i32, i32
  }
}

</mosaic_0001>

<bundles_post_ra>
// kernel: tpu_custom_call.1
= control target key start
LH: loop header
LB: loop body
LE: loop exit
PB: predicated region body
PF: predicated region fallthrough
CT: control target
= control target key end

     0   :  { %13 = vsyncpa [#allocation5], 0  ;;  %s487_s0 = inlined_call_operand.vmem [shape: f32[8], index: 0, kind: input, shape index: {}]   ;;  %s488_s1 = inlined_call_operand.vmem [shape: f32[4], index: 1, kind: input, shape index: {}]   ;;  %s489_s2 = inlined_call_operand.vmem [shape: f32[12], index: 2, kind: input, shape index: {}]   ;;  %s490_s3 = inlined_call_operand.vmem [shape: f32[3], index: 3, kind: input, shape index: {}]   ;;  %s491_s4 = inlined_call_operand.vmem [shape: f32[3], index: 4, kind: input, shape index: {}]   ;;  %s492_s5 = inlined_call_operand.<no memory space> [shape: f32[1], index: 5, kind: input, shape index: {}]   ;;  %s493_s6 = inlined_call_operand.vmem [shape: f32[2,128], index: 6, kind: input, shape index: {}]   ;;  %s494_s7 = inlined_call_operand.hbm [shape: f32[1,128], index: 7, kind: output, shape index: {}]  }
   0x1   :  { %14 = vsyncpa [#allocation7], 0 }
   0x2   :  { %15 = vsyncpa [#allocation10], 0  ;;  %s33_s26 = sshll.u32 %s488_s1, 4  ;;  %s34_s26 = int_to_ptr.vmem [resolvable:$true] %s33_s26 }
   0x3   :  { %16 = vsyncpa [#allocation4], 0  ;;  %s53_s29 = sshll.u32 %s490_s3, 4  ;;  %s267_s30 = scalar_lea.vmem %s34_s26, 16  ;;  %s54_s29 = int_to_ptr.vmem [resolvable:$true] %s53_s29 }
   0x4   :  { %p268_p0 = scmp.ne.s32.totalorder %s34_s26, %s267_s30  ;;  %p272_p1 = scmp.lt.s32.totalorder %s34_s26, %s34_s26 }
   0x5   :  { %p273_p2 = scmp.lt.s32.totalorder %s267_s30, %s267_s30 }
   0x7   :  { %p274_p3 = por %p273_p2, %p272_p1 }
   0x9   :  { %p275_p4 = pnand %p274_p3, %p268_p0 }
   0xb   :  { %278 = shalt.err (!%p275_p4)
}
   0xc   :  { %s357_s8 = smov [#allocation6]   ;;  %s279_s9 = scalar_lea.vmem %s54_s29, 16 }
   0xd   :  { %36 = dma.vmem_to_smem %s34_s26, 16, %s357_s8, [#allocation7]  }
   0xe   :  { %p280_p5 = scmp.ne.s32.totalorder %s54_s29, %s279_s9  ;;  %p284_p6 = scmp.lt.s32.totalorder %s54_s29, %s54_s29 }
   0xf   :  { %p285_p7 = scmp.lt.s32.totalorder %s279_s9, %s279_s9 }
  0x11   :  { %p286_p8 = por %p285_p7, %p284_p6 }
  0x13   :  { %p287_p9 = pnand %p286_p8, %p280_p5 }
  0x15   :  { %290 = shalt.err (!%p287_p9)
}
  0x16   :  { %s358_s1 = smov [#allocation9]   ;;  %s23_s11 = sshll.u32 %s487_s0, 4  ;;  %s24_s11 = int_to_ptr.vmem [resolvable:$true] %s23_s11 }
  0x17   :  { %56 = dma.vmem_to_smem %s54_s29, 16, %s358_s1, [#allocation10]  }
  0x18   :  { %s43_s14 = sshll.u32 %s489_s2, 4  ;;  %s291_s15 = scalar_lea.vmem %s24_s11, 16  ;;  %s44_s14 = int_to_ptr.vmem [resolvable:$true] %s43_s14 }
  0x19   :  { %p292_p10 = scmp.ne.s32.totalorder %s24_s11, %s291_s15  ;;  %p296_p11 = scmp.lt.s32.totalorder %s24_s11, %s24_s11 }
  0x1a   :  { %p297_p12 = scmp.lt.s32.totalorder %s291_s15, %s291_s15 }
  0x1c   :  { %p298_p13 = por %p297_p12, %p296_p11 }
  0x1e   :  { %p299_p0 = pnand %p298_p13, %p292_p10 }
  0x20   :  { %302 = shalt.err (!%p299_p0)
}
  0x21   :  { %s359_s16 = smov [#allocation3]   ;;  %s303_s17 = scalar_lea.vmem %s44_s14, 16 }
  0x22   :  { %26 = dma.vmem_to_smem %s24_s11, 16, %s359_s16, [#allocation5]  }
  0x23   :  { %p304_p1 = scmp.ne.s32.totalorder %s44_s14, %s303_s17  ;;  %p308_p2 = scmp.lt.s32.totalorder %s44_s14, %s44_s14 }
  0x24   :  { %p309_p3 = scmp.lt.s32.totalorder %s303_s17, %s303_s17 }
  0x26   :  { %p310_p4 = por %p309_p3, %p308_p2 }
  0x28   :  { %p311_p5 = pnand %p310_p4, %p304_p1 }
  0x2a   :  { %314 = shalt.err (!%p311_p5)
}
  0x2b   :  { %s360_s0 = smov [#allocation8]   ;;  %s63_s19 = sshll.u32 %s491_s4, 4  ;;  %s64_s19 = int_to_ptr.vmem [resolvable:$true] %s63_s19 }
  0x2c   :  { %46 = dma.vmem_to_smem %s44_s14, 16, %s360_s0, [#allocation7]  }
  0x2d   :  { %s315_s20 = scalar_lea.vmem %s64_s19, 16  ;;  %p320_p7 = scmp.lt.s32.totalorder %s64_s19, %s64_s19 }
  0x2e   :  { %p316_p6 = scmp.ne.s32.totalorder %s64_s19, %s315_s20  ;;  %p321_p8 = scmp.lt.s32.totalorder %s315_s20, %s315_s20 }
  0x30   :  { %p322_p9 = por %p321_p8, %p320_p7 }
  0x32   :  { %p323_p10 = pnand %p322_p9, %p316_p6 }
  0x34   :  { %326 = shalt.err (!%p323_p10)
}
  0x35   :  { %s361_s21 = smov [#allocation11]  }
  0x36   :  { %66 = dma.vmem_to_smem %s64_s19, 16, %s361_s21, [#allocation10]  }
  0x37   :  { %349 = dma.done.wait [#allocation5], 16  }
  0x38   :  { %350 = vsyncadd [#allocation5], 4294967280 }
  0x39   :  { %351 = dma.done.wait [#allocation7], 32  }
  0x3a   :  { %352 = vsyncadd [#allocation7], 4294967264 }
  0x3b   :  { %353 = dma.done.wait [#allocation10], 32  }
  0x3c   :  { %354 = vsyncadd [#allocation10], 4294967264 }
  0x3d   :  { %86 = sfence }
  0x3e   :  { %s89_s22 = sld [smem:[#allocation3]]  ;;  %s222_s23 = sld [smem:[#allocation3 + $0x1]]  ;;  %v87_v0 = vld [vmem:[%s493_s6] sm:$0x1]  ;;  %v88_v1 = vld [vmem:[%s493_s6 + $0x1] sm:$0x1] }
  0x3f   :  { %s418_s4 = sld [smem:[#allocation6]]  ;;  %s223_s24 = sld [smem:[#allocation3 + $0x2]] }
  0x40   :  { %s224_s25 = sld [smem:[#allocation3 + $0x3]]  ;;  %s420_s26 = sld [smem:[#allocation6 + $0x1]] }
  0x41   :  { %s226_s27 = sld [smem:[#allocation3 + $0x4]]  ;;  %s227_s30 = sld [smem:[#allocation3 + $0x5]] }
  0x42   :  { %s425_s8 = sld [smem:[#allocation6 + $0x2]]  ;;  %s229_s3 = sld [smem:[#allocation3 + $0x6]] }
  0x43   :  { %s230_s10 = sld [smem:[#allocation3 + $0x7]]  ;;  %s430_s11 = sld [smem:[#allocation6 + $0x3]] }
  0x44   :  { %v90_v2 = vstv %s89_s22  ;;  %v93_v4 = vstv %s222_s23  ;;  %s435_s6 = sld [smem:[#allocation8]]  ;;  %s438_s12 = sld [smem:[#allocation8 + $0x1]] }
  0x45   :  { %v91_v3 = vmul.f32 %v90_v2, %v87_v0  ;;  %v94_v5 = vmul.f32 %v93_v4, %v88_v1  ;;  %v101_v6 = vstv %s223_s24  ;;  %v97_v8 = vstv %s418_s4  ;;  %s440_s13 = sld [smem:[#allocation8 + $0x2]]  ;;  %s235_s14 = sld [smem:[#allocation8 + $0x4]] }
  0x46   :  { %v104_v7 = vstv %s224_s25  ;;  %v102_v9 = vmul.f32 %v101_v6, %v87_v0  ;;  %v108_v13 = vstv %s420_s26  ;;  %s442_s15 = sld [smem:[#allocation8 + $0x8]]  ;;  %s236_s16 = sld [smem:[#allocation8 + $0x5]] }
  0x47   :  { %v105_v10 = vmul.f32 %v104_v7, %v88_v1  ;;  %v112_v11 = vstv %s226_s27  ;;  %v95_v12 = vadd.f32 %v94_v5, %v91_v3  ;;  %v115_v15 = vstv %s227_s30  ;;  %s241_s17 = sld [smem:[#allocation8 + $0x9]]  ;;  %s444_s0 = sld [smem:[#allocation8 + $0x3]] }
  0x48   :  { %v113_v14 = vmul.f32 %v112_v11, %v87_v0  ;;  %v116_v17 = vmul.f32 %v115_v15, %v88_v1  ;;  %v123_v18 = vstv %s229_s3  ;;  %v119_v21 = vstv %s425_s8  ;;  %s446_s2 = sld [smem:[#allocation8 + $0x6]]  ;;  %s448_s18 = sld [smem:[#allocation8 + $0x7]] }
  0x49   :  { %v106_v16 = vadd.f32 %v105_v10, %v102_v9  ;;  %v126_v19 = vstv %s230_s10  ;;  %v98_v20 = vadd.f32 %v97_v8, %v95_v12  ;;  %v124_v22 = vmul.f32 %v123_v18, %v87_v0  ;;  %s450_s19 = sld [smem:[#allocation8 + $0xa]]  ;;  %s452_s20 = sld [smem:[#allocation8 + $0xb]] }
  0x4a   :  { %v127_v23 = vmul.f32 %v126_v19, %v88_v1  ;;  %v117_v25 = vadd.f32 %v116_v17, %v113_v14  ;;  %v130_v26 = vstv %s430_s11  ;;  %v134_v30 = vstv %s435_s6  ;;  %s457_s21 = sld [smem:[#allocation9]]  ;;  %s459_s22 = sld [smem:[#allocation9 + $0x1]] }
  0x4b   :  { %v109_v24 = vadd.f32 %v108_v13, %v106_v16  ;;  %253 = vtanh.f32 %v98_v20  ;;  %v153_v31 = vstv %s235_s14  ;;  %v137_v33 = vstv %s438_s12  ;;  %s464_s23 = sld [smem:[#allocation9 + $0x2]]  ;;  %s190_s4 = sld [smem:[#allocation11]] }
  0x4c   :  { %v128_v27 = vadd.f32 %v127_v23, %v124_v22  ;;  %v120_v28 = vadd.f32 %v119_v21, %v117_v25  ;;  %v172_v32 = vstv %s442_s15  ;;  %v156_v34 = vstv %s236_s16  ;;  %s245_s24 = sld [smem:[#allocation11 + $0x1]]  ;;  %s246_s25 = sld [smem:[#allocation11 + $0x2]] }
  0x4d   :  { %255 = vtanh.f32 %v109_v24  ;;  %v175_v35 = vstv %s241_s17  ;;  %v141_v37 = vstv %s440_s13  ;;  %v145_v38 = vstv %s444_s0  ;;  %s362_s28 = smov [#allocation12]  }
  0x4e   :  { %v131_v29 = vadd.f32 %v130_v26, %v128_v27  ;;  %257 = vtanh.f32 %v120_v28  ;;  %v160_v39 = vstv %s446_s2  ;;  %v164_v43 = vstv %s448_s18  ;;  %s211_s29 = sshll.u32 %s362_s28, 4  ;;  %s212_s29 = int_to_ptr.vmem [resolvable:$true] %s211_s29 }
  0x4f   :  { %v179_v48 = vstv %s450_s19  ;;  %v183_v50 = vstv %s452_s20  ;;  %v202_v19 = vstv %s492_s5  ;;  %s327_s30 = scalar_lea.vmem %s212_s29, 16  ;;  %s331_s8 = scalar_lea.vmem %s212_s29, 32 }
  0x50   :  { %259 = vtanh.f32 %v131_v29  ;;  %v149_v63 = vstv %s457_s21  ;;  %v168_v0 = vstv %s459_s22  ;;  %p328_p11 = scmp.ne.s32.totalorder %s212_s29, %s327_s30  ;;  %p332_p12 = scmp.lt.s32.totalorder %s212_s29, %s212_s29 }
  0x51   :  { %v187_v4 = vstv %s464_s23  ;;  %v191_v9 = vstv %s190_s4  ;;  %p333_p13 = scmp.lt.s32.totalorder %s331_s8, %s327_s30 }
  0x52   :  { %v194_v10 = vstv %s245_s24  ;;  %v198_v12 = vstv %s246_s25 }
  0x53   :  { %p334_p0 = por %p333_p13, %p332_p12 }
  0x55   :  { %v254_v36 = vpop.eup %253  ;;  %p335_p1 = pnand %p334_p0, %p328_p11 }
  0x56   :  { %v135_v41 = vmul.f32 %v254_v36, %v134_v30  ;;  %v154_v42 = vmul.f32 %v254_v36, %v153_v31  ;;  %v173_v44 = vmul.f32 %v254_v36, %v172_v32 }
  0x57   :  { %v256_v40 = vpop.eup %255 }
  0x58   :  { %v138_v45 = vmul.f32 %v256_v40, %v137_v33  ;;  %v157_v46 = vmul.f32 %v256_v40, %v156_v34  ;;  %v176_v47 = vmul.f32 %v256_v40, %v175_v35  ;;  %v258_v49 = vpop.eup %257 }
  0x59   :  { %v142_v53 = vmul.f32 %v258_v49, %v141_v37  ;;  %v161_v55 = vmul.f32 %v258_v49, %v160_v39  ;;  %v180_v59 = vmul.f32 %v258_v49, %v179_v48 }
  0x5a   :  { %v260_v51 = vpop.eup %259  ;;  %v139_v52 = vadd.f32 %v138_v45, %v135_v41  ;;  %v158_v54 = vadd.f32 %v157_v46, %v154_v42  ;;  %v177_v58 = vadd.f32 %v176_v47, %v173_v44 }
  0x5b   :  { %v146_v56 = vmul.f32 %v260_v51, %v145_v38  ;;  %v165_v57 = vmul.f32 %v260_v51, %v164_v43  ;;  %v184_v62 = vmul.f32 %v260_v51, %v183_v50 }
  0x5c   :  { %v143_v60 = vadd.f32 %v142_v53, %v139_v52  ;;  %v162_v61 = vadd.f32 %v161_v55, %v158_v54  ;;  %v181_v1 = vadd.f32 %v180_v59, %v177_v58 }
  0x5e   :  { %v147_v2 = vadd.f32 %v146_v56, %v143_v60  ;;  %v166_v3 = vadd.f32 %v165_v57, %v162_v61  ;;  %v185_v5 = vadd.f32 %v184_v62, %v181_v1 }
  0x60   :  { %v150_v6 = vadd.f32 %v149_v63, %v147_v2  ;;  %v169_v7 = vadd.f32 %v168_v0, %v166_v3  ;;  %v188_v8 = vadd.f32 %v187_v4, %v185_v5 }
  0x62   :  { %261 = vtanh.f32 %v150_v6 }
  0x63   :  { %263 = vtanh.f32 %v169_v7 }
  0x64   :  { %265 = vtanh.f32 %v188_v8 }
  0x6c   :  { %v262_v11 = vpop.eup %261 }
  0x6d   :  { %v264_v13 = vpop.eup %263  ;;  %v192_v14 = vmul.f32 %v262_v11, %v191_v9 }
  0x6e   :  { %v266_v15 = vpop.eup %265  ;;  %v195_v16 = vmul.f32 %v264_v13, %v194_v10 }
  0x6f   :  { %v199_v17 = vmul.f32 %v266_v15, %v198_v12 }
  0x70   :  { %v196_v18 = vadd.f32 %v195_v16, %v192_v14 }
  0x72   :  { %v200_v20 = vadd.f32 %v199_v17, %v196_v18 }
  0x74   :  { %v203_v21 = vadd.f32 %v202_v19, %v200_v20 }
  0x76   :  { %204 = vst [vmem:[#allocation12] sm:$0x1] %v203_v21 }
  0x77   :  { %338 = shalt.err (!%p335_p1)
}
  0x78   :  { %s339_s3 = scalar_lea.hbm %s494_s7, 16 }
  0x79   :  { %p340_p2 = scmp.ne.s32.totalorder %s494_s7, %s339_s3  ;;  %p343_p3 = scmp.lt.u32.totalorder %s339_s3, %s494_s7 }
  0x7b   :  { %p345_p4 = pnand %p343_p3, %p340_p2 }
  0x7d   :  { %348 = shalt.err (!%p345_p4)
}
  0x7e   :  { %214 = dma.vmem_to_hbm [thread:$0]  %s212_s29, 16, %s494_s7, [#allocation4]  }
  0x7f   :  { %355 = dma.done.wait [#allocation4], 16  }
  0x80   :  { %356 = vsyncadd [#allocation4], 4294967280 }
  0x81   :  { %218 = vsyncpa [#allocation4], 1 }
  0x82   :  { %219 = vsyncpa [#allocation5], 1 }
  0x83   :  { %220 = vsyncpa [#allocation7], 1 }
  0x84   :  { %221 = vsyncpa [#allocation10], 1 }

</bundles_post_ra>
